<compile_context>
chip_gen: v5e
topology: v5e:2x2
jax: 0.10.0
libtpu: 0.0.40
codegen_flags: <defaults>
</compile_context>

<pallas_src>
import functools

import jax
import jax.numpy as jnp
from jax import lax
from jax.experimental import pallas as pl
from jax.experimental.pallas import tpu as pltpu


def _round_up(n, m):
    return ((n + m - 1) // m) * m


def _vmem_capacity_bytes():
    try:
        info = pltpu.get_tpu_info()
        for name in ("vmem_capacity_bytes", "vmem_size_bytes", "vmem_bytes"):
            v = getattr(info, name, None)
            if v:
                return int(v)
    except Exception:
        pass
    return 64 << 20  # conservative (v7x-sized) fallback


# --------------------------------------------------------------------------- kernels
def _folded_kernel(x_ref, w_ref, o_ref, stacked_ref, halo_ref, *,
                   kernel_size, dilation, pad, c_in, c_in_p, bias_rows, carry_halo):
    """Tiny-contraction path: one MXU matmul over the stacked (K*C_in_p + bias) rows."""
    t = pl.program_id(1)
    tile_t = x_ref.shape[2]
    kc = kernel_size * c_in_p

    @pl.when(t == 0)
    def _():
        # Zero the channel-pad rows (never written per step), set the folded-bias rows to
        # ones, and clear the causal halo.  Runs once per batch element.
        stacked_ref[...] = jnp.zeros_like(stacked_ref)
        stacked_ref[kc:, :] = jnp.ones((bias_rows, tile_t), stacked_ref.dtype)
        if pad > 0:
            halo_ref[...] = jnp.zeros_like(halo_ref)

    x_cur = x_ref[0]                                     # (c_in, tile_t), small here

    for k in range(kernel_size):
        shift = pad - k * dilation                       # columns sourced from the halo
        r0 = k * c_in_p
        h = min(shift, tile_t)
        if h > 0:
            stacked_ref[r0:r0 + c_in, 0:h] = halo_ref[:, k * dilation:k * dilation + h]
        if h < tile_t:
            stacked_ref[r0:r0 + c_in, h:tile_t] = x_cur[:, 0:tile_t - h]

    if carry_halo:
        halo_ref[...] = x_cur[:, tile_t - pad:tile_t]

    # Single MXU matmul; bias is folded via the ones-rows / bias-column of the weight.
    acc = jnp.dot(w_ref[...], stacked_ref[...], preferred_element_type=jnp.float32)
    o_ref[0] = acc.astype(o_ref.dtype)


def _window_kernel(x_ref, w_ref, b_ref, o_ref, window_ref, *,
                   kernel_size, dilation, pad, c_in, carry_halo):
    """Large-channel path: [halo | x] window scratch + K accumulated matmuls from the ref."""
    t = pl.program_id(1)
    tile_t = x_ref.shape[2]

    @pl.when(t == 0)
    def _():
        window_ref[...] = jnp.zeros_like(window_ref)     # zero halo + channel-pad rows

    window_ref[0:c_in, pad:pad + tile_t] = x_ref[0]

    acc = None
    for k in range(kernel_size):
        part = jnp.dot(w_ref[k],
                       window_ref[:, k * dilation:k * dilation + tile_t],
                       preferred_element_type=jnp.float32)
        acc = part if acc is None else acc + part
    o_ref[0] = (acc + b_ref[...]).astype(o_ref.dtype)

    if carry_halo:
        # Non-overlapping copy: tile_t >= pad is enforced whenever num_t > 1.
        window_ref[:, 0:pad] = window_ref[:, tile_t:tile_t + pad]


# --------------------------------------------------------------------------- wrapper
def causal_conv1d(x, weight, bias, *, dilation=1, tile_t=None):
    """Causal dilated Conv1d.  x: (B, C_in, T); weight: (C_out, C_in, K); bias: (C_out,)."""
    B, c_in, T = x.shape
    c_out, wc_in, K = weight.shape
    assert wc_in == c_in
    pad = dilation * (K - 1)
    dtype = x.dtype
    itemsize = jnp.dtype(dtype).itemsize
    sub = max(8, 32 // itemsize)                 # sublane packing: 8 f32 / 16 bf16 / 32 int8
    c_in_p = _round_up(c_in, sub)

    folded = K * c_in_p <= 256                   # tiny contraction -> single folded matmul

    # ---- time tiling: big enough that each grid step moves ~1 MiB ----------------------
    min_tile = max(256, _round_up(max(pad, 1), 128))
    if tile_t is None:
        bytes_per_col = (c_in + c_out) * itemsize
        tile_t = ((1 << 20) // max(bytes_per_col, 1)) // 256 * 256
        tile_t = max(min_tile, min(8192, tile_t))
    else:
        tile_t = max(128, tile_t // 128 * 128)

    def _est_bytes(tt):
        blocks = 2 * (c_in + c_out) * tt * itemsize            # double-buffered in/out blocks
        if folded:
            kc = K * c_in_p
            return (blocks + c_out * (kc + sub) * itemsize     # weight (+ folded bias cols)
                    + (kc + sub) * tt * itemsize               # stacked-tap scratch
                    + c_in * max(pad, 1) * itemsize)           # halo scratch
        return (blocks + K * c_out * c_in_p * itemsize + c_out * 4
                + c_in_p * (pad + tt) * itemsize)              # window scratch

    vmem_cap = _vmem_capacity_bytes()
    budget = min(int(vmem_cap * 0.45), 48 << 20)               # ~28 MiB on v7x, <=48 MiB else
    while _est_bytes(min(tile_t, T)) > budget and tile_t > min_tile:
        tile_t = max(min_tile, _round_up(tile_t // 2, 128))

    if tile_t >= T:
        tile_t, num_t = T, 1
    else:
        num_t = -(-T // tile_t)
        assert tile_t % 128 == 0, "tile_t must be a multiple of 128 when tiling T"
        assert tile_t >= pad, "tile_t must be >= dilation*(K-1) so the halo fits in one tile"

    est = _est_bytes(tile_t)
    vmem_limit = int(min(max(est + (4 << 20), 16 << 20), max(vmem_cap - (8 << 20), 16 << 20)))

    carry_halo = (num_t > 1) and (pad > 0)

    # ---- weights (tiny; the only arrays padded/reshaped in HBM) ------------------------
    w_pad = weight
    if c_in_p != c_in:
        w_pad = jnp.pad(weight, ((0, 0), (0, c_in_p - c_in), (0, 0)))

    if folded:
        # (C_out, C_in_p, K) -> (C_out, K*C_in_p), plus `sub` bias columns (ones-row trick).
        w2 = jnp.transpose(w_pad, (0, 2, 1)).reshape(c_out, K * c_in_p)
        bias_cols = jnp.concatenate(
            [bias.reshape(c_out, 1), jnp.zeros((c_out, sub - 1), bias.dtype)], axis=1)
        w2 = jnp.concatenate([w2, bias_cols], axis=1).astype(dtype)

        kernel = functools.partial(
            _folded_kernel, kernel_size=K, dilation=dilation, pad=pad,
            c_in=c_in, c_in_p=c_in_p, bias_rows=sub, carry_halo=carry_halo)
        in_specs = [
            pl.BlockSpec((1, c_in, tile_t), lambda b, t: (b, 0, t)),
            pl.BlockSpec((c_out, K * c_in_p + sub), lambda b, t: (0, 0)),
        ]
        operands = (x, w2)
        scratch_shapes = [
            pltpu.VMEM((K * c_in_p + sub, tile_t), dtype),     # stacked taps (+ bias rows)
            pltpu.VMEM((c_in, max(pad, 1)), dtype),            # causal halo carry
        ]
    else:
        # (C_out, C_in_p, K) -> (K, C_out, C_in_p); bias stays a separate f32 epilogue.
        w3 = jnp.transpose(w_pad, (2, 0, 1)).astype(dtype)
        b2 = bias.astype(jnp.float32).reshape(c_out, 1)

        kernel = functools.partial(
            _window_kernel, kernel_size=K, dilation=dilation, pad=pad,
            c_in=c_in, carry_halo=carry_halo)
        in_specs = [
            pl.BlockSpec((1, c_in, tile_t), lambda b, t: (b, 0, t)),
            pl.BlockSpec((K, c_out, c_in_p), lambda b, t: (0, 0, 0)),
            pl.BlockSpec((c_out, 1), lambda b, t: (0, 0)),
        ]
        operands = (x, w3, b2)
        scratch_shapes = [
            pltpu.VMEM((c_in_p, pad + tile_t), dtype),         # [halo | x] window
        ]

    # TODO(synk): on v7x with B==1 the second TensorCore idles; breaking the time-axis halo
    # dependence with overlapping (pad + tile_t) window loads would let the time axis be
    # marked "parallel" there.
    out = pl.pallas_call(
        kernel,
        out_shape=jax.ShapeDtypeStruct((B, c_out, T), dtype),
        grid_spec=pltpu.PrefetchScalarGridSpec(
            num_scalar_prefetch=0,
            grid=(B, num_t),
            in_specs=in_specs,
            out_specs=pl.BlockSpec((1, c_out, tile_t), lambda b, t: (b, 0, t)),
            scratch_shapes=scratch_shapes,
        ),
        compiler_params=pltpu.CompilerParams(
            # Time axis must stay sequential (halo carry); batch shards across cores.
            dimension_semantics=("parallel", "arbitrary"),
            vmem_limit_bytes=vmem_limit,
        ),
    )(*operands)
    return out


# --------------------------------------------------------------------------- reference
def _reference_causal_conv1d(x, weight, bias, *, dilation=1):
    K = weight.shape[-1]
    pad = dilation * (K - 1)
    out = lax.conv_general_dilated(
        x, weight,
        window_strides=(1,),
        padding=[(pad, 0)],
        rhs_dilation=(dilation,),
        dimension_numbers=("NCH", "OIH", "NCH"),
    )
    return out + bias.reshape(1, -1, 1)


if __name__ == "__main__":
    key = jax.random.PRNGKey(0)
    kx, kw, kb = jax.random.split(key, 3)

    # 1) Module-sized case: CausalConv1d(4, 6, 3, dilation=2), single time tile, f32.
    B, C_IN, C_OUT, T, K, DIL = 2, 4, 6, 16, 3, 2
    x = jax.random.normal(kx, (B, C_IN, T), dtype=jnp.float32)
    w = jax.random.normal(kw, (C_OUT, C_IN, K), dtype=jnp.float32) * 0.1
    b = jax.random.normal(kb, (C_OUT,), dtype=jnp.float32) * 0.1

    out = jax.block_until_ready(causal_conv1d(x, w, b, dilation=DIL))
    ref = _reference_causal_conv1d(x, w, b, dilation=DIL)
    assert out.shape == (B, C_OUT, T), out.shape
    assert jnp.allclose(out, ref, atol=1e-5, rtol=1e-5), float(jnp.max(jnp.abs(out - ref)))

    # 2) Multi-tile + non-divisible T (halo carry + partial last tile), f32, folded path.
    T2 = 360                                    # 3 tiles of 128 (last one partial)
    x2 = jax.random.normal(jax.random.fold_in(kx, 1), (B, C_IN, T2), dtype=jnp.float32)
    out2 = jax.block_until_ready(causal_conv1d(x2, w, b, dilation=DIL, tile_t=128))
    ref2 = _reference_causal_conv1d(x2, w, b, dilation=DIL)
    assert out2.shape == (B, C_OUT, T2), out2.shape
    assert jnp.allclose(out2, ref2, atol=1e-5, rtol=1e-5), float(jnp.max(jnp.abs(out2 - ref2)))

    # 3) Larger channels -> window-scratch / K-matmul path (also hits a partial last tile).
    C3_IN, C3_OUT, T3 = 96, 64, 384
    x3 = jax.random.normal(jax.random.fold_in(kx, 2), (B, C3_IN, T3), dtype=jnp.float32)
    w3 = jax.random.normal(jax.random.fold_in(kw, 2), (C3_OUT, C3_IN, K),
                           dtype=jnp.float32) * 0.05
    b3 = jax.random.normal(jax.random.fold_in(kb, 2), (C3_OUT,), dtype=jnp.float32) * 0.1
    out3 = jax.block_until_ready(causal_conv1d(x3, w3, b3, dilation=DIL, tile_t=256))
    ref3 = _reference_causal_conv1d(x3, w3, b3, dilation=DIL)
    assert out3.shape == (B, C3_OUT, T3), out3.shape
    assert jnp.allclose(out3, ref3, atol=2e-3, rtol=2e-3), float(jnp.max(jnp.abs(out3 - ref3)))

    # 4) Caller-provided bf16 activations (no wrapper-side cast of x), loose tolerance.
    x4 = x2.astype(jnp.bfloat16)
    out4 = jax.block_until_ready(causal_conv1d(x4, w, b, dilation=DIL, tile_t=128))
    ref4 = _reference_causal_conv1d(x4.astype(jnp.float32), w, b, dilation=DIL)
    assert out4.dtype == jnp.bfloat16
    assert jnp.allclose(out4.astype(jnp.float32), ref4, atol=3e-2, rtol=3e-2), \
        float(jnp.max(jnp.abs(out4.astype(jnp.float32) - ref4)))

    print("KERNEL_OK")
</pallas_src>

<mosaic_0001>
module attributes {stable_mosaic.version = 11 : i64} {
  func.func @_folded_kernel(%arg0: i32, %arg1: i32, %arg2: memref<1x4x16xf32, #tpu.memory_space<vmem>>, %arg3: memref<6x32xf32, #tpu.memory_space<vmem>>, %arg4: memref<1x6x16xf32, #tpu.memory_space<vmem>>, %arg5: memref<32x16xf32, #tpu.memory_space<vmem>>, %arg6: memref<4x4xf32, #tpu.memory_space<vmem>>) attributes {dimension_semantics = [#tpu.dimension_semantics<parallel>, #tpu.dimension_semantics<arbitrary>], iteration_bounds = array<i64: 2, 1>, scalar_prefetch = 0 : i64, scratch_operands = 2 : i64, tpu.core_type = #tpu.core_type<tc>, window_params = [{transform_indices = @transform_0, window_bounds = array<i64: 1, 4, 16>}, {pipeline_mode = #tpu.pipeline_mode<synchronous>, transform_indices = @transform_1, window_bounds = array<i64: 6, 32>}, {transform_indices = @transform_2, window_bounds = array<i64: 1, 6, 16>}]} {
    %c0_i32 = arith.constant 0 : i32
    %0 = arith.cmpi eq, %arg1, %c0_i32 : i32
    %1 = arith.extui %0 : i1 to i32
    %c0_i32_0 = arith.constant 0 : i32
    %2 = arith.cmpi ne, %1, %c0_i32_0 : i32
    scf.if %2 {
      %cst_20 = arith.constant 0.000000e+00 : f32
      %20 = vector.broadcast %cst_20 : f32 to vector<32x16xf32>
      %c0_21 = arith.constant 0 : index
      %c0_22 = arith.constant 0 : index
      %21 = vector.load %arg5[%c0_21, %c0_22] : memref<32x16xf32, #tpu.memory_space<vmem>>, vector<32x16xf32>
      tpu.vector_store %arg5[%c0_21, %c0_22], %20 {strides = array<i32>} : memref<32x16xf32, #tpu.memory_space<vmem>>, vector<32x16xf32>,
      %cst_23 = arith.constant 1.000000e+00 : f32
      %22 = vector.broadcast %cst_23 : f32 to vector<8x16xf32>
      %c24 = arith.constant 24 : index
      %c0_24 = arith.constant 0 : index
      %23 = vector.load %arg5[%c24, %c0_24] : memref<32x16xf32, #tpu.memory_space<vmem>>, vector<8x16xf32>
      tpu.vector_store %arg5[%c24, %c0_24], %22 {strides = array<i32>} : memref<32x16xf32, #tpu.memory_space<vmem>>, vector<8x16xf32>,
      %cst_25 = arith.constant 0.000000e+00 : f32
      %24 = vector.broadcast %cst_25 : f32 to vector<4x4xf32>
      %c0_26 = arith.constant 0 : index
      %c0_27 = arith.constant 0 : index
      %25 = vector.load %arg6[%c0_26, %c0_27] : memref<4x4xf32, #tpu.memory_space<vmem>>, vector<4x4xf32>
      tpu.vector_store %arg6[%c0_26, %c0_27], %24 {strides = array<i32>} : memref<4x4xf32, #tpu.memory_space<vmem>>, vector<4x4xf32>,
    } else {
    }
    %c0 = arith.constant 0 : index
    %c0_1 = arith.constant 0 : index
    %c0_2 = arith.constant 0 : index
    %3 = vector.load %arg2[%c0, %c0_1, %c0_2] : memref<1x4x16xf32, #tpu.memory_space<vmem>>, vector<1x4x16xf32>
    %4 = vector.shape_cast %3 : vector<1x4x16xf32> to vector<4x16xf32>
    %c0_3 = arith.constant 0 : index
    %c0_4 = arith.constant 0 : index
    %5 = vector.load %arg6[%c0_3, %c0_4] : memref<4x4xf32, #tpu.memory_space<vmem>>, vector<4x4xf32>
    %c0_5 = arith.constant 0 : index
    %c0_6 = arith.constant 0 : index
    %6 = vector.load %arg5[%c0_5, %c0_6] : memref<32x16xf32, #tpu.memory_space<vmem>>, vector<4x4xf32>
    tpu.vector_store %arg5[%c0_5, %c0_6], %5 {strides = array<i32>} : memref<32x16xf32, #tpu.memory_space<vmem>>, vector<4x4xf32>,
    %7 = vector.extract_strided_slice %4 {offsets = [0, 0], sizes = [4, 12], strides = [1, 1]} : vector<4x16xf32> to vector<4x12xf32>
    %c0_7 = arith.constant 0 : index
    %c4 = arith.constant 4 : index
    %8 = vector.load %arg5[%c0_7, %c4] : memref<32x16xf32, #tpu.memory_space<vmem>>, vector<4x12xf32>
    tpu.vector_store %arg5[%c0_7, %c4], %7 {strides = array<i32>} : memref<32x16xf32, #tpu.memory_space<vmem>>, vector<4x12xf32>,
    %c0_8 = arith.constant 0 : index
    %c2 = arith.constant 2 : index
    %9 = vector.load %arg6[%c0_8, %c2] : memref<4x4xf32, #tpu.memory_space<vmem>>, vector<4x2xf32>
    %c8 = arith.constant 8 : index
    %c0_9 = arith.constant 0 : index
    %10 = vector.load %arg5[%c8, %c0_9] : memref<32x16xf32, #tpu.memory_space<vmem>>, vector<4x2xf32>
    tpu.vector_store %arg5[%c8, %c0_9], %9 {strides = array<i32>} : memref<32x16xf32, #tpu.memory_space<vmem>>, vector<4x2xf32>,
    %11 = vector.extract_strided_slice %4 {offsets = [0, 0], sizes = [4, 14], strides = [1, 1]} : vector<4x16xf32> to vector<4x14xf32>
    %c8_10 = arith.constant 8 : index
    %c2_11 = arith.constant 2 : index
    %12 = vector.load %arg5[%c8_10, %c2_11] : memref<32x16xf32, #tpu.memory_space<vmem>>, vector<4x14xf32>
    tpu.vector_store %arg5[%c8_10, %c2_11], %11 {strides = array<i32>} : memref<32x16xf32, #tpu.memory_space<vmem>>, vector<4x14xf32>,
    %c16 = arith.constant 16 : index
    %c0_12 = arith.constant 0 : index
    %13 = vector.load %arg5[%c16, %c0_12] : memref<32x16xf32, #tpu.memory_space<vmem>>, vector<4x16xf32>
    tpu.vector_store %arg5[%c16, %c0_12], %4 {strides = array<i32>} : memref<32x16xf32, #tpu.memory_space<vmem>>, vector<4x16xf32>,
    %c0_13 = arith.constant 0 : index
    %c0_14 = arith.constant 0 : index
    %14 = vector.load %arg3[%c0_13, %c0_14] : memref<6x32xf32, #tpu.memory_space<vmem>>, vector<6x32xf32>
    %c0_15 = arith.constant 0 : index
    %c0_16 = arith.constant 0 : index
    %15 = vector.load %arg5[%c0_15, %c0_16] : memref<32x16xf32, #tpu.memory_space<vmem>>, vector<32x16xf32>
    %cst = arith.constant dense<0.000000e+00> : vector<6x16xf32>
    %16 = tpu.matmul %14, %15, %cst {dimension_numbers = #tpu.dot_dimension_numbers<[1], [0], [0], [1], [0, 0, 1, 1], [], []>} : vector<6x32xf32>, vector<32x16xf32>, vector<6x16xf32> -> vector<6x16xf32>
    %c0_17 = arith.constant 0 : index
    %c0_18 = arith.constant 0 : index
    %c0_19 = arith.constant 0 : index
    %17 = vector.load %arg4[%c0_17, %c0_18, %c0_19] : memref<1x6x16xf32, #tpu.memory_space<vmem>>, vector<1x6x16xf32>
    %18 = vector.shape_cast %17 : vector<1x6x16xf32> to vector<6x16xf32>
    %19 = vector.shape_cast %16 : vector<6x16xf32> to vector<1x6x16xf32>
    tpu.vector_store %arg4[%c0_17, %c0_18, %c0_19], %19 {strides = array<i32>} : memref<1x6x16xf32, #tpu.memory_space<vmem>>, vector<1x6x16xf32>,
    return
  }
  func.func @transform_0(%arg0: i32, %arg1: i32) -> (i32, i32, i32) {
    %c0_i32 = arith.constant 0 : i32
    %c0_i32_0 = arith.constant 0 : i32
    return %arg0, %c0_i32, %arg1 : i32, i32, i32
  }
  func.func @transform_1(%arg0: i32, %arg1: i32) -> (i32, i32) {
    %c0_i32 = arith.constant 0 : i32
    %c0_i32_0 = arith.constant 0 : i32
    %c0_i32_1 = arith.constant 0 : i32
    return %c0_i32, %c0_i32_0 : i32, i32
  }
  func.func @transform_2(%arg0: i32, %arg1: i32) -> (i32, i32, i32) {
    %c0_i32 = arith.constant 0 : i32
    %c0_i32_0 = arith.constant 0 : i32
    return %arg0, %c0_i32, %arg1 : i32, i32, i32
  }
}

</mosaic_0001>

<bundles_post_ra>
// kernel: tpu_custom_call.1
= control target key start
LH: loop header
LB: loop body
LE: loop exit
PB: predicated region body
PF: predicated region fallthrough
CT: control target
= control target key end

     0   :  { %7 = vsyncpa [#allocation5], 0  ;;  %s695_s0 = inlined_call_operand.hbm [shape: f32[2,4,16], index: 0, kind: input, shape index: {}]   ;;  %s696_s1 = inlined_call_operand.hbm [shape: f32[6,32], index: 1, kind: input, shape index: {}]   ;;  %s697_s2 = inlined_call_operand.vmem [shape: f32[2,6,16], index: 2, kind: output, shape index: {}]  }
   0x1   :  { %9 = vsyncpa [#allocation5 + $0x1], 0 }
   0x2   :  { %10 = vsyncpa [#allocation7], 0  ;;  %s582_s9 = smov 0   ;;  %s584_s10 = smov 0  }
   0x3   :  { %s586_s11 = smov 0   ;;  %s588_s12 = smov 0  }
   0x4   :  { %s590_s13 = smov 0   ;;  %s592_s14 = smov 0  }
   0x5 LB: > { %s360_s15 = sadd.s32 4294967295, %s559_s14   ;;  %p50_p0 = scmp.ne.s32.totalorder %s543_s10, %s539_s9  ;;  %s559_s14 = sphi %s592_s14, %s16_s14   ;;  %s555_s13 = sphi %s590_s13, %s706_s13   ;;  %s551_s12 = sphi %s588_s12, %s705_s12   ;;  %s547_s11 = sphi %s586_s11, %s704_s11   ;;  %s543_s10 = sphi %s584_s10, %s703_s10   ;;  %s539_s9 = sphi %s582_s9, %s702_s9  }
   0x6   : > { %p612_p1 = scmp.eq.s32.totalorder %s360_s15, 0  ;;  %p362_p2 = scmp.ge.s32.totalorder %s559_s14, 1 }
   0x7   : > { %p110_p3 = scmp.lt.s32.totalorder %s559_s14, 3  ;;  %s122_s20 = sshll.u32 %s696_s1, 4  ;;  %s123_s20 = int_to_ptr.hbm [resolvable:$true] %s122_s20 }
   0x8   : > { %p620_p4 = por %p612_p1, %p50_p0  ;;  %s561_s22 = smov [#allocation6]  }
   0x9   : > { %p627_p5 = pnand %p362_p2, %p110_p3  ;;  %s124_s23 = sshll.u32 %s561_s22, 4  ;;  %s125_s23 = int_to_ptr.vmem [resolvable:$true] %s124_s23 }
   0xa   : > { %s28_s24 = sadd.s32 1, %s555_s13  ;;  %p44_p9 = scmp.ne.s32.totalorder %s547_s11, %s543_s10 }
   0xb   : > { %p380_p6 = pneg %p627_p5  ;;  %p30_p8 = scmp.ge.s32.totalorder %s28_s24, 2 }
   0xc   : > { %p45_p10 = scmp.eq.s32.totalorder %s559_s14, 0  ;;  %s37_s25 = sadd.s32 1, %s547_s11 }
   0xd   : > { %p381_p7 = pnand %p380_p6, %p612_p1  ;;  %s708_s24 = smov (%p30_p8, %s28_s24), 0 }
   0xe   : > { %p642_p11 = por %p45_p10, %p44_p9  ;;  %s32_s27 = ssub.s32 %s555_s13, %s708_s24 }
   0xf   : > { %383 = dma.hbm_to_vmem [thread:$0]  (!%p381_p7), %s123_s20, 128, %s125_s23, [#allocation7]  }
  0x10   : > { %s135_s28 = sand.u32 1, %s547_s11   ;;  %p35_p12 = scmp.eq.s32.totalorder %s32_s27, 0 }
  0x11   : > { %p389_p13 = scmp.lt.s32.totalorder %s559_s14, 2  ;;  %s365_s29 = sshll.u32 %s135_s28, 2 }
  0x12   : > { %s366_s30 = sshll.u32 %s555_s13, 2  ;;  %s139_s8 = scalar_lea.vmem [#allocation4], %s365_s29 }
  0x13   : > { %s652_s3 = scalar_select %p35_p12, %s547_s11, %s37_s25  }
  0x14   : > { %s144_s6 = scalar_lea.hbm %s695_s0, %s366_s30  ;;  %s148_s9 = sshll.u32 %s139_s8, 4  ;;  %s149_s9 = int_to_ptr.vmem [resolvable:$true] %s148_s9 }
  0x15   : > { %s146_s7 = sshll.u32 %s144_s6, 4  ;;  %p385_p0 = pnand %p389_p13, %p642_p11  ;;  %s147_s7 = int_to_ptr.hbm [resolvable:$true] %s146_s7 }
  0x16   : > { %s136_s15 = scalar_lea.sflag [#allocation5], %s135_s28  ;;  %157 = sbr.rel (%p627_p5) target bundleno = 300 (0x12c), region = 28 }
  0x17   : > { %387 = dma.hbm_to_vmem [thread:$0]  (!%p385_p0), %s147_s7, 64, %s149_s9, %s136_s15  }
  0x18   : > { %s159_s18 = sand.u32 (!%p627_p5), 1, %s543_s10  }
  0x19   : > { %s368_s19 = sshll.u32 (!%p627_p5), %s159_s18, 2  ;;  %s160_s20 = scalar_lea.sflag (!%p627_p5), [#allocation5], %s159_s18 }
  0x1a   : > { %s163_s22 = scalar_lea.vmem (!%p627_p5), [#allocation4], %s368_s19 }
  0x1b   : > { %530 = dma.done.wait (%p620_p4), %s160_s20, 64  }
  0x1c   : > { %532 = vsyncadd (%p620_p4), %s160_s20, 4294967232 }
  0x1d   : > { %534 = dma.done.wait (%p612_p1), [#allocation7], 128  }
  0x1e   : > { %536 = vsyncadd (%p612_p1), [#allocation7], 4294967168  ;;  %vm209_vm0 = vcmask 27648   ;;  %v562_v0 = vmov 0.0   ;;  %vm203_vm1 = vcmask 130048   ;;  %v563_v1 = vmov 1.0  }
  0x1f   : > { %210 = vst.msk [vmem:[#allocation3] sm:$0xf] %vm209_vm0, %v562_v0  ;;  %vm233_vm2 = vcmask 125952   ;;  %v211_v2 = vld [vmem:[%s163_s22] sm:$0xf]  ;;  %s564_s17 = smov 4  }
  0x20   : > { %206 = vst.msk [vmem:[#allocation2 + $0x10] sm:$0xff] %vm203_vm1, %v562_v0  ;;  %216 = vrot.lane.b32.xlu1 %v211_v2, %s564_s17  ;;  %s565_s21 = smov 126   ;;  %s566_s16 = smov 2   ;;  %vm219_vm3 = vcmask 125984   ;;  %vm226_vm4 = vcmask 11264   ;;  %vm231_vm5 = vcmask 125968  }
  0x21   : > { %207 = vst.msk [vmem:[#allocation2 + $0x18] sm:$0xff] %vm203_vm1, %v562_v0  ;;  %v235_v12 = vld [vmem:[#allocation6] sm:$0x3f]  ;;  %vm240_vm6 = vcmask 261120   ;;  %p192_p1 = scmp.lt.s32.totalorder %s551_s12, 1  ;;  %vm264_vm7 = vcmask 128000  }
  0x22   : > { %208 = vst.msk [vmem:[#allocation2 + $0x18] sm:$0xff] %vm203_vm1, %v563_v1 }
  0x23   : > { %204 = vst.msk [vmem:[#allocation2] sm:$0xff] %vm203_vm1, %v562_v0  ;;  %s710_s12 = smov (!%p192_p1, %s551_s12), 1 }
  0x24   : > { %205 = vst.msk [vmem:[#allocation2 + $0x8] sm:$0xff] %vm203_vm1, %v562_v0  ;;  %s370_s23 = sshll.u32 %s710_s12, 3 }
  0x25   : > { %234 = vst.msk [vmem:[#allocation2 + $0x10] sm:$0xf] %vm233_vm2, %v211_v2  ;;  %s198_s27 = scalar_lea.vmem %s697_s2, %s370_s23 }
  0x26   : > { %v221_v3 = vld [vmem:[#allocation3] sm:$0xf] }
  0x27   : > { %223 = vrot.lane.b32.xlu0 %v221_v3, %s565_s21  ;;  %v212_v4 = vld [vmem:[#allocation3] sm:$0xf] }
  0x28   : > { %214 = vst.msk [vmem:[#allocation2] sm:$0xf] %vm209_vm0, %v212_v4 }
  0x29   : > { %v239_v5 = vld [vmem:[#allocation2 + $0x18] sm:$0xff] }
  0x2a   : > { %256 = vmatpush.msra.mxu0 %v239_v5 }
  0x2c   : > { %v238_v6 = vld [vmem:[#allocation2 + $0x10] sm:$0xff] }
  0x2d   : > { %257 = vmatpush.msra.mxu0 %v238_v6 }
  0x2f   : > { %228 = vrot.lane.b32.xlu0 %v211_v2, %s566_s16 }
  0x92   : > { %v217_v7 = vpop.permute.xlu1 %216 }
  0x93   : > { %220 = vst.msk [vmem:[#allocation2] sm:$0xf] %vm219_vm3, %v217_v7 }
  0x99   : > { %v224_v8 = vpop.permute.xlu0 %223 }
  0x9a   : > { %227 = vst.msk [vmem:[#allocation2 + $0x8] sm:$0xf] %vm226_vm4, %v224_v8  ;;  %v236_v11 = vld [vmem:[#allocation2] sm:$0xff] }
  0xa1   : > { %v229_v9 = vpop.permute.xlu0 %228 }
  0xa2   : > { %232 = vst.msk [vmem:[#allocation2 + $0x8] sm:$0xf] %vm231_vm5, %v229_v9 }
  0xa9   : > { %v237_v10 = vld [vmem:[#allocation2 + $0x8] sm:$0xff] }
  0xaa   : > { %258 = vmatpush.msra.mxu0 %v237_v10 }
  0xac   : > { %259 = vmatpush.msra.mxu0 %v236_v11 }
  0xad   : > { %371 = vmatmul.msk.f32.vlgmr.msra.gmra.mxu0 %vm240_vm6, %v235_v12 }
 0x12a   : > { %v261_v13 = vpop.f32.mrf.mxu0 }
 0x12b   : > { %265 = vst.msk [vmem:[%s198_s27] sm:$0x3f] %vm264_vm7, %v261_v13 }
 0x12c PF: > { %s16_s14 = sadd.s32 1, %s559_s14   ;;  %s702_s9 = smov %s543_s10 }
 0x12d   : > { %p13_p2 = scmp.ge.s32.totalorder %s16_s14, 4   ;;  %s703_s10 = smov %s547_s11 }
 0x12e   : > { %s704_s11 = smov %s652_s3  ;;  %s705_s12 = smov %s555_s13 }
 0x12f   : > { %s706_s13 = smov %s708_s24  ;;  %15 = sbr.rel (!%p13_p2) target bundleno = 5 (0x5), region = 76 }
 0x134   :  { %291 = vsyncpa [#allocation5], 1 }
 0x135   :  { %293 = vsyncpa [#allocation5 + $0x1], 1 }
 0x136   :  { %294 = vsyncpa [#allocation7], 1 }

</bundles_post_ra>
